<compile_context>
chip_gen: v6e
topology: v6e:2x2x1
jax: 0.10.0
libtpu: 0.0.40
codegen_flags: <defaults>
</compile_context>

<pallas_src>
import jax
import jax.numpy as jnp
from jax.experimental import pallas as pl
from jax.experimental.pallas import tpu as pltpu


def _section_css_kernel(x_ref, w1_ref, b1_ref, w2bd_ref, b2t_ref, o_ref):
    """One grid step over ALL sections.

    x_ref   : (N*S, I)   all sections' rows stacked (section-major)
    w1_ref  : (I, C)     css1 weight
    b1_ref  : (1, C)     css1 bias
    w2bd_ref: (N*S, N*C) block-diagonal css2 weight = kron(eye(N), W2)
    b2t_ref : (1, N*C)   css2 bias tiled N times
    o_ref   : (C, N*C)   o[a, n*C + b] = relu( sum_s h[n, s, a] * W2[s, b] + b2[b] )
    """
    # First layer: one full-width MXU op over all sections (M = N*S).
    g = jnp.dot(x_ref[...], w1_ref[...], preferred_element_type=jnp.float32)
    g = jnp.maximum(g + b1_ref[...], 0.0)                       # (N*S, C)

    # Second layer: per-section h.T @ W2 for every section in ONE trans-A matmul
    # against the block-diagonal weight -> lane-dense (C, N*C) output.
    y = jax.lax.dot_general(
        g, w2bd_ref[...],
        dimension_numbers=(((0,), (0,)), ((), ())),
        preferred_element_type=jnp.float32,
    )
    o_ref[...] = jnp.maximum(y + b2t_ref[...], 0.0)             # (C, N*C)


def pack_params(w1, b1, w2, b2, num_sections):
    """One-time parameter prep (hoist out of the per-call path)."""
    n = num_sections
    w2bd = jnp.kron(jnp.eye(n, dtype=w2.dtype), w2)             # (N*S, N*C) block-diag
    b2t = jnp.tile(b2.reshape(1, -1), (1, n))                   # (1, N*C)
    return w1, b1.reshape(1, -1), w2bd, b2t


@jax.jit
def section_css_batched(xs, w1, b1, w2bd, b2t):
    """xs: (N, S, I) stacked sections + packed params. Returns (N, C*C)."""
    n, s, i = xs.shape
    iw, c = w1.shape
    assert iw == i, (w1.shape, i)
    assert w2bd.shape == (n * s, n * c), (w2bd.shape, n, s, c)
    assert b1.shape == (1, c) and b2t.shape == (1, n * c)

    x2 = xs.reshape(n * s, i)

    flops = 2 * (n * s) * i * c + 2 * c * (n * s) * (n * c)
    bytes_accessed = 4 * (x2.size + w1.size + b1.size + w2bd.size + b2t.size
                          + c * n * c)

    yk = pl.pallas_call(
        _section_css_kernel,
        out_shape=jax.ShapeDtypeStruct((c, n * c), jnp.float32),
        grid=(1,),
        in_specs=[
            pl.BlockSpec((n * s, i), lambda k: (0, 0)),
            pl.BlockSpec((i, c), lambda k: (0, 0)),
            pl.BlockSpec((1, c), lambda k: (0, 0)),
            pl.BlockSpec((n * s, n * c), lambda k: (0, 0)),
            pl.BlockSpec((1, n * c), lambda k: (0, 0)),
        ],
        out_specs=pl.BlockSpec((c, n * c), lambda k: (0, 0)),
        cost_estimate=pl.CostEstimate(
            flops=flops, transcendentals=0, bytes_accessed=bytes_accessed),
    )(x2, w1, b1, w2bd, b2t)

    # Undo the lane-dense layout: yk[a, n*C + b] -> out[n, a*C + b]  (pure layout
    # plumbing in the wrapper; matches the module's per-section flatten()).
    out = yk.reshape(c, n, c).transpose(1, 0, 2).reshape(n, c * c)
    return out


def section_css(x, w1, b1, w2, b2):
    """Original module semantics: x (sectionsize, inputsize) -> flat (crosssize**2,)."""
    w1p, b1p, w2bd, b2t = pack_params(w1, b1, w2, b2, num_sections=1)
    return section_css_batched(x[None], w1p, b1p, w2bd, b2t)[0]


def _reference_single(x, w1, b1, w2, b2):
    h = jnp.maximum(x @ w1 + b1, 0.0)
    y = jnp.maximum(h.T @ w2 + b2, 0.0)
    return y.reshape(-1)


def _init_linear(key, fan_in, fan_out):
    # PyTorch nn.Linear default init: U(-1/sqrt(fan_in), 1/sqrt(fan_in))
    kw, kb = jax.random.split(key)
    bound = 1.0 / (fan_in ** 0.5)
    w = jax.random.uniform(kw, (fan_in, fan_out), jnp.float32, -bound, bound)
    b = jax.random.uniform(kb, (1, fan_out), jnp.float32, -bound, bound)
    return w, b


if __name__ == "__main__":
    # sectionsize = len(gv['baseuids']) -> 8 here; small, module-consistent shapes.
    sectionsize, inputsize, crosssize = 8, 32, 16
    num_sections = 8     # batch of sections handled by one pallas_call (N*C = 128 lanes)

    key = jax.random.PRNGKey(0)
    kx, k1, k2 = jax.random.split(key, 3)

    xs = jax.random.normal(kx, (num_sections, sectionsize, inputsize), jnp.float32)
    w1, b1 = _init_linear(k1, inputsize, crosssize)      # css1: inputsize   -> crosssize
    w2, b2 = _init_linear(k2, sectionsize, crosssize)    # css2: sectionsize -> crosssize

    w1p, b1p, w2bd, b2t = pack_params(w1, b1, w2, b2, num_sections)

    # Batched path: all sections in a single pallas_call, single grid step.
    out_b = jax.block_until_ready(section_css_batched(xs, w1p, b1p, w2bd, b2t))
    assert out_b.shape == (num_sections, crosssize * crosssize), out_b.shape
    ref_b = jax.vmap(lambda x: _reference_single(x, w1, b1, w2, b2))(xs)
    # Tolerance accommodates MXU f32 multi-pass vs. XLA default dot precision.
    max_err = float(jnp.max(jnp.abs(out_b - ref_b)))
    assert jnp.allclose(out_b, ref_b, atol=1e-2, rtol=1e-2), max_err

    # Single-section path (matches the original module forward exactly).
    out_1 = jax.block_until_ready(section_css(xs[0], w1, b1, w2, b2))
    assert out_1.shape == (crosssize * crosssize,)
    assert jnp.allclose(out_1, _reference_single(xs[0], w1, b1, w2, b2),
                        atol=1e-2, rtol=1e-2)

    print("KERNEL_OK")
</pallas_src>

<mosaic_0001>
module attributes {stable_mosaic.version = 11 : i64} {
  func.func @_section_css_kernel(%arg0: i32, %arg1: memref<64x32xf32, #tpu.memory_space<vmem>>, %arg2: memref<32x16xf32, #tpu.memory_space<vmem>>, %arg3: memref<1x16xf32, #tpu.memory_space<vmem>>, %arg4: memref<64x128xf32, #tpu.memory_space<vmem>>, %arg5: memref<1x128xf32, #tpu.memory_space<vmem>>, %arg6: memref<16x128xf32, #tpu.memory_space<vmem>>) attributes {dimension_semantics = [#tpu.dimension_semantics<arbitrary>], iteration_bounds = array<i64: 1>, scalar_prefetch = 0 : i64, scratch_operands = 0 : i64, tpu.core_type = #tpu.core_type<tc>, window_params = [{pipeline_mode = #tpu.pipeline_mode<synchronous>, transform_indices = @transform_0, window_bounds = array<i64: 64, 32>}, {pipeline_mode = #tpu.pipeline_mode<synchronous>, transform_indices = @transform_1, window_bounds = array<i64: 32, 16>}, {pipeline_mode = #tpu.pipeline_mode<synchronous>, transform_indices = @transform_2, window_bounds = array<i64: 1, 16>}, {pipeline_mode = #tpu.pipeline_mode<synchronous>, transform_indices = @transform_3, window_bounds = array<i64: 64, 128>}, {pipeline_mode = #tpu.pipeline_mode<synchronous>, transform_indices = @transform_4, window_bounds = array<i64: 1, 128>}, {pipeline_mode = #tpu.pipeline_mode<synchronous>, transform_indices = @transform_5, window_bounds = array<i64: 16, 128>}]} {
    %c0 = arith.constant 0 : index
    %c0_0 = arith.constant 0 : index
    %0 = vector.load %arg1[%c0, %c0_0] : memref<64x32xf32, #tpu.memory_space<vmem>>, vector<64x32xf32>
    %c0_1 = arith.constant 0 : index
    %c0_2 = arith.constant 0 : index
    %1 = vector.load %arg2[%c0_1, %c0_2] : memref<32x16xf32, #tpu.memory_space<vmem>>, vector<32x16xf32>
    %cst = arith.constant dense<0.000000e+00> : vector<64x16xf32>
    %2 = tpu.matmul %0, %1, %cst {dimension_numbers = #tpu.dot_dimension_numbers<[1], [0], [0], [1], [0, 0, 1, 1], [], []>} : vector<64x32xf32>, vector<32x16xf32>, vector<64x16xf32> -> vector<64x16xf32>
    %c0_3 = arith.constant 0 : index
    %c0_4 = arith.constant 0 : index
    %3 = vector.load %arg3[%c0_3, %c0_4] : memref<1x16xf32, #tpu.memory_space<vmem>>, vector<1x16xf32>
    %4 = vector.broadcast %3 : vector<1x16xf32> to vector<64x16xf32>
    %5 = arith.addf %2, %4 : vector<64x16xf32>
    %cst_5 = arith.constant 0.000000e+00 : f32
    %6 = vector.broadcast %cst_5 : f32 to vector<64x16xf32>
    %7 = arith.maximumf %5, %6 : vector<64x16xf32>
    %c0_6 = arith.constant 0 : index
    %c0_7 = arith.constant 0 : index
    %8 = vector.load %arg4[%c0_6, %c0_7] : memref<64x128xf32, #tpu.memory_space<vmem>>, vector<64x128xf32>
    %cst_8 = arith.constant dense<0.000000e+00> : vector<16x128xf32>
    %9 = tpu.matmul %7, %8, %cst_8 {dimension_numbers = #tpu.dot_dimension_numbers<[0], [0], [1], [1], [0, 1, 1, 1], [], []>} : vector<64x16xf32>, vector<64x128xf32>, vector<16x128xf32> -> vector<16x128xf32>
    %c0_9 = arith.constant 0 : index
    %c0_10 = arith.constant 0 : index
    %10 = vector.load %arg5[%c0_9, %c0_10] : memref<1x128xf32, #tpu.memory_space<vmem>>, vector<1x128xf32>
    %11 = vector.broadcast %10 : vector<1x128xf32> to vector<16x128xf32>
    %12 = arith.addf %9, %11 : vector<16x128xf32>
    %cst_11 = arith.constant 0.000000e+00 : f32
    %13 = vector.broadcast %cst_11 : f32 to vector<16x128xf32>
    %14 = arith.maximumf %12, %13 : vector<16x128xf32>
    %c0_12 = arith.constant 0 : index
    %c0_13 = arith.constant 0 : index
    %15 = vector.load %arg6[%c0_12, %c0_13] : memref<16x128xf32, #tpu.memory_space<vmem>>, vector<16x128xf32>
    tpu.vector_store %arg6[%c0_12, %c0_13], %14 {strides = array<i32>} : memref<16x128xf32, #tpu.memory_space<vmem>>, vector<16x128xf32>,
    return
  }
  func.func @transform_0(%arg0: i32) -> (i32, i32) {
    %c0_i32 = arith.constant 0 : i32
    %c0_i32_0 = arith.constant 0 : i32
    %c0_i32_1 = arith.constant 0 : i32
    return %c0_i32, %c0_i32_0 : i32, i32
  }
  func.func @transform_1(%arg0: i32) -> (i32, i32) {
    %c0_i32 = arith.constant 0 : i32
    %c0_i32_0 = arith.constant 0 : i32
    %c0_i32_1 = arith.constant 0 : i32
    return %c0_i32, %c0_i32_0 : i32, i32
  }
  func.func @transform_2(%arg0: i32) -> (i32, i32) {
    %c0_i32 = arith.constant 0 : i32
    %c0_i32_0 = arith.constant 0 : i32
    %c0_i32_1 = arith.constant 0 : i32
    return %c0_i32, %c0_i32_0 : i32, i32
  }
  func.func @transform_3(%arg0: i32) -> (i32, i32) {
    %c0_i32 = arith.constant 0 : i32
    %c0_i32_0 = arith.constant 0 : i32
    %c0_i32_1 = arith.constant 0 : i32
    return %c0_i32, %c0_i32_0 : i32, i32
  }
  func.func @transform_4(%arg0: i32) -> (i32, i32) {
    %c0_i32 = arith.constant 0 : i32
    %c0_i32_0 = arith.constant 0 : i32
    %c0_i32_1 = arith.constant 0 : i32
    return %c0_i32, %c0_i32_0 : i32, i32
  }
  func.func @transform_5(%arg0: i32) -> (i32, i32) {
    %c0_i32 = arith.constant 0 : i32
    %c0_i32_0 = arith.constant 0 : i32
    %c0_i32_1 = arith.constant 0 : i32
    return %c0_i32, %c0_i32_0 : i32, i32
  }
}

</mosaic_0001>

<bundles_post_ra>
// kernel: section_css_batched.1
= control target key start
LH: loop header
LB: loop body
LE: loop exit
PB: predicated region body
PF: predicated region fallthrough
CT: control target
= control target key end

     0   :  { %10 = vsyncpa [#allocation3], 0  ;;  %s538_s0 = inlined_call_operand.hbm [shape: f32[64,32], index: 0, kind: input, shape index: {}]   ;;  %s539_s1 = inlined_call_operand.vmem [shape: f32[32,16], index: 1, kind: input, shape index: {}]   ;;  %s540_s2 = inlined_call_operand.vmem [shape: f32[1,16], index: 2, kind: input, shape index: {}]   ;;  %s541_s3 = inlined_call_operand.hbm [shape: f32[64,128], index: 3, kind: input, shape index: {}]   ;;  %s542_s4 = inlined_call_operand.vmem [shape: f32[1,128], index: 4, kind: input, shape index: {}]   ;;  %s543_s5 = inlined_call_operand.vmem [shape: f32[16,128], index: 5, kind: output, shape index: {}]  }
   0x1   :  { %11 = vsyncpa [#allocation5], 0  ;;  %s466_s18 = smov [#allocation2]  }
   0x2   :  { %s17_s19 = sshll.u32 %s466_s18, 4  ;;  %s18_s19 = int_to_ptr.vmem [resolvable:$true] %s17_s19 }
   0x3   :  { %s430_s20 = scalar_lea.vmem %s18_s19, 1024  ;;  %p435_p1 = scmp.lt.s32.totalorder %s18_s19, %s18_s19 }
   0x4   :  { %p431_p0 = scmp.ne.s32.totalorder %s18_s19, %s430_s20  ;;  %p436_p2 = scmp.lt.s32.totalorder %s430_s20, %s430_s20 }
   0x6   :  { %p437_p3 = por %p436_p2, %p435_p1 }
   0x8   :  { %p438_p4 = pnand %p437_p3, %p431_p0 }
   0xa   :  { %441 = shalt.err (!%p438_p4)
}
   0xb   :  { %s467_s21 = smov 128   ;;  %s468_s22 = smov 8  }
   0xc   :  { %23 = dma.hbm_to_vmem [thread:$0]  %s538_s0, 1024, %s18_s19, [#allocation3], %s467_s21, %s467_s21, %s468_s22  }
   0xd   :  { %s469_s25 = smov [#allocation4]  }
   0xe   :  { %s33_s26 = sshll.u32 %s469_s25, 4  ;;  %s34_s26 = int_to_ptr.vmem [resolvable:$true] %s33_s26 }
   0xf   :  { %s450_s27 = scalar_lea.vmem %s34_s26, 1024  ;;  %p455_p6 = scmp.lt.s32.totalorder %s34_s26, %s34_s26 }
  0x10   :  { %p451_p5 = scmp.ne.s32.totalorder %s34_s26, %s450_s27  ;;  %p456_p7 = scmp.lt.s32.totalorder %s450_s27, %s450_s27 }
  0x12   :  { %p457_p8 = por %p456_p7, %p455_p6 }
  0x14   :  { %p458_p9 = pnand %p457_p8, %p451_p5 }
  0x16   :  { %461 = shalt.err (!%p458_p9)
}
  0x17   :  { %39 = dma.hbm_to_vmem [thread:$0]  %s541_s3, 1024, %s34_s26, [#allocation5], %s467_s21, %s467_s21, %s468_s22  }
  0x18   :  { %462 = dma.done.wait [#allocation3], 1024  }
  0x19   :  { %463 = vsyncadd [#allocation3], 4294966272 }
  0x1a   :  { %464 = dma.done.wait [#allocation5], 1024  }
  0x1b   :  { %465 = vsyncadd [#allocation5], 4294966272  ;;  %vm67_vm0 = vcmask 261120   ;;  %v59_v0 = vld [vmem:[%s539_s1 + $0x18] sm:$0xff]  ;;  %v58_v1 = vld [vmem:[%s539_s1 + $0x10] sm:$0xff]  ;;  %vm252_vm1 = vcmask 523264  }
  0x1c   :  { %378 = vmatprep.subr.mxu0 %v59_v0  ;;  %v48_v2 = vld [vmem:[#allocation2] sm:$0xff]  ;;  %v57_v3 = vld [vmem:[%s539_s1 + $0x8] sm:$0xff]  ;;  %v50_v6 = vld [vmem:[#allocation2 + $0x10] sm:$0xff] }
  0x1d   :  { %379 = vmatpush3.msra.mxu0 %v59_v0  ;;  %386 = vmatprep.mubr.msk.f32.mxu0 %vm67_vm0, %v48_v2  ;;  %v56_v4 = vld [vmem:[%s539_s1] sm:$0xff]  ;;  %v49_v5 = vld [vmem:[#allocation2 + $0x8] sm:$0xff]  ;;  %v51_v7 = vld [vmem:[#allocation2 + $0x18] sm:$0xff] }
  0x1e   :  { %380 = vmatprep.subr.mxu0 %v58_v1  ;;  %v52_v8 = vld [vmem:[#allocation2 + $0x20] sm:$0xff]  ;;  %v53_v9 = vld [vmem:[#allocation2 + $0x28] sm:$0xff]  ;;  %v54_v10 = vld [vmem:[#allocation2 + $0x30] sm:$0xff] }
  0x1f   :  { %381 = vmatpush3.msra.mxu0 %v58_v1  ;;  %v55_v11 = vld [vmem:[#allocation2 + $0x38] sm:$0xff]  ;;  %v211_v13 = vld [vmem:[#allocation4 + $0x30] sm:$0xff]  ;;  %v210_v14 = vld [vmem:[#allocation4 + $0x28] sm:$0xff] }
  0x20   :  { %382 = vmatprep.subr.mxu0 %v57_v3  ;;  %v212_v12 = vld [vmem:[#allocation4 + $0x38] sm:$0xff]  ;;  %v209_v15 = vld [vmem:[#allocation4 + $0x20] sm:$0xff]  ;;  %v207_v17 = vld [vmem:[#allocation4 + $0x10] sm:$0xff] }
  0x21   :  { %383 = vmatpush3.msra.mxu0 %v57_v3  ;;  %398 = vmatprep.subr.mxu1 %v212_v12  ;;  %v208_v16 = vld [vmem:[#allocation4 + $0x18] sm:$0xff]  ;;  %v344_v19 = vld [vmem:[%s540_s2] ss:$0 sm:$0xff]  ;;  %v206_v22 = vld [vmem:[#allocation4 + $0x8] sm:$0xff] }
  0x22   :  { %384 = vmatprep.subr.mxu0 %v56_v4  ;;  %399 = vmatpush3.msra.mxu1 %v212_v12  ;;  %v205_v24 = vld [vmem:[#allocation4] sm:$0xff] }
  0x23   :  { %385 = vmatpush3.msra.mxu0 %v56_v4  ;;  %400 = vmatprep.subr.mxu1 %v211_v13  ;;  %v353_v47 = vld [vmem:[%s542_s4] ss:$0 sm:$0xff] }
  0x24   :  { %387 = vmatmul.mubr.msk.f32.vlgmr.msra.gmra.mxu0 %vm67_vm0, %v49_v5  ;;  %401 = vmatpush3.msra.mxu1 %v211_v13 }
  0x25   :  { %389 = vmatprep.mubr.msk.f32.mxu0 %vm67_vm0, %v50_v6  ;;  %402 = vmatprep.subr.mxu1 %v210_v14 }
  0x26   :  { %403 = vmatpush3.msra.mxu1 %v210_v14 }
  0x27   :  { %404 = vmatprep.subr.mxu1 %v209_v15 }
  0x28   :  { %390 = vmatmul.mubr.msk.f32.gmra.mxu0 %vm67_vm0, %v51_v7  ;;  %405 = vmatpush3.msra.mxu1 %v209_v15 }
  0x29   :  { %392 = vmatprep.mubr.msk.f32.mxu0 %vm67_vm0, %v52_v8  ;;  %406 = vmatprep.subr.mxu1 %v208_v16 }
  0x2a   :  { %407 = vmatpush3.msra.mxu1 %v208_v16 }
  0x2b   :  { %408 = vmatprep.subr.mxu1 %v207_v17 }
  0x2c   :  { %393 = vmatmul.mubr.msk.f32.gmra.mxu0 %vm67_vm0, %v53_v9  ;;  %409 = vmatpush3.msra.mxu1 %v207_v17 }
  0x2d   :  { %395 = vmatprep.mubr.msk.f32.mxu0 %vm67_vm0, %v54_v10  ;;  %410 = vmatprep.subr.mxu1 %v206_v22 }
  0x2e   :  { %411 = vmatpush3.msra.mxu1 %v206_v22 }
  0x2f   :  { %412 = vmatprep.subr.mxu1 %v205_v24 }
  0x30   :  { %396 = vmatmul.mubr.msk.f32.gmra.mxu0 %vm67_vm0, %v55_v11  ;;  %413 = vmatpush3.msra.mxu1 %v205_v24 }
  0xe4   :  { %v388_v18 = vpop.f32.mrf.mxu0 }
  0xe5   :  { %v164_v25 = vadd.f32 %v388_v18, %v344_v19 }
  0xe6   :  { %v158_v20 = vpop.f32.mrf.mxu0 }
  0xe7   :  { %v159_v21 = vadd.f32 %v344_v19, %v158_v20  ;;  %v198_v28 = vmax.f32 %v164_v25, 0.0 }
  0xe8   :  { %v391_v23 = vpop.f32.mrf.mxu0 }
  0xe9   :  { %v197_v26 = vmax.f32 %v159_v21, 0.0  ;;  %v174_v31 = vadd.f32 %v391_v23, %v344_v19 }
  0xea   :  { %v168_v27 = vpop.f32.mrf.mxu0 }
  0xeb   :  { %220 = vxpose.xlu0.b32.start [1/8] (short) (narrow) %v197_v26, 16  ;;  %v169_v29 = vadd.f32 %v344_v19, %v168_v27  ;;  %v200_v34 = vmax.f32 %v174_v31, 0.0 }
  0xec   :  { %v394_v30 = vpop.f32.mrf.mxu0 }
  0xed   :  { %v199_v32 = vmax.f32 %v169_v29, 0.0  ;;  %v184_v37 = vadd.f32 %v394_v30, %v344_v19 }
  0xee   :  { %v178_v33 = vpop.f32.mrf.mxu0 }
  0xef   :  { %221 = vxpose.xlu0.b32.cont [2/8] (short) (narrow) %v198_v28, 16  ;;  %v179_v35 = vadd.f32 %v344_v19, %v178_v33  ;;  %v202_v40 = vmax.f32 %v184_v37, 0.0 }
  0xf0   :  { %v397_v36 = vpop.f32.mrf.mxu0 }
  0xf1   :  { %v201_v38 = vmax.f32 %v179_v35, 0.0  ;;  %v194_v42 = vadd.f32 %v397_v36, %v344_v19 }
  0xf2   :  { %v188_v39 = vpop.f32.mrf.mxu0 }
  0xf3   :  { %222 = vxpose.xlu0.b32.cont [3/8] (short) (narrow) %v199_v32, 16  ;;  %v189_v41 = vadd.f32 %v344_v19, %v188_v39  ;;  %v204_v44 = vmax.f32 %v194_v42, 0.0 }
  0xf5   :  { %v203_v43 = vmax.f32 %v189_v41, 0.0 }
  0xf7   :  { %223 = vxpose.xlu0.b32.cont [4/8] (short) (narrow) %v200_v34, 16 }
  0xfb   :  { %224 = vxpose.xlu0.b32.cont [5/8] (short) (narrow) %v201_v38, 16 }
  0xff   :  { %225 = vxpose.xlu0.b32.cont [6/8] (short) (narrow) %v202_v40, 16 }
 0x103   :  { %226 = vxpose.xlu0.b32.cont [7/8] (short) (narrow) %v203_v43, 16 }
 0x107   :  { %227 = vxpose.xlu0.b32.end [8/8] (short) (narrow) %v204_v44, 16 }
 0x167   :  { %v236_v45 = vpop.trf.xlu0 }
 0x168   :  { %414 = vmatprep.mubr.msk.f32.mxu1 %vm252_vm1, %v236_v45 }
 0x16b   :  { %v237_v46 = vpop.trf.xlu0 }
 0x16c   :  { %415 = vmatmul.mubr.msk.f32.vlgmr.msra.gmra.mxu1 %vm252_vm1, %v237_v46 }
 0x22c   :  { %v416_v48 = vpop.f32.mrf.mxu1 }
 0x22d   :  { %v331_v49 = vadd.f32 %v416_v48, %v353_v47 }
 0x22e   :  { %v325_v50 = vpop.f32.mrf.mxu1 }
 0x22f   :  { %v335_v51 = vmax.f32 %v331_v49, 0.0  ;;  %v326_v52 = vadd.f32 %v353_v47, %v325_v50 }
 0x231   :  { %337 = vst [vmem:[%s543_s5 + $0x8] sm:$0xff] %v335_v51  ;;  %v334_v53 = vmax.f32 %v326_v52, 0.0 }
 0x233   :  { %336 = vst [vmem:[%s543_s5] sm:$0xff] %v334_v53 }
 0x234   :  { %342 = vsyncpa [#allocation3], 1 }
 0x235   :  { %343 = vsyncpa [#allocation5], 1 }

</bundles_post_ra>
